<compile_context>
chip_gen: v5e
topology: v5e:2x2
jax: 0.10.0
libtpu: 0.0.40
codegen_flags: <defaults>
</compile_context>

<pallas_src>
import functools

import jax
import jax.numpy as jnp
from jax.experimental import pallas as pl
from jax.experimental.pallas import tpu as pltpu

_LANE = 128
_SUBLANE = 8


def _round_up(n, m):
    return ((n + m - 1) // m) * m


def _make_fused_kernel(num_layers):
    """Kernel: refs = (x, w0, b0, w1, b1, ..., out). All layers fused; the intermediate
    activation never leaves vregs/VMEM (no HBM round-trip, one kernel launch total)."""

    def kernel(*refs):
        x_ref = refs[0]
        o_ref = refs[-1]
        y = x_ref[...].astype(jnp.float32)
        for i in range(num_layers):
            w = refs[1 + 2 * i][...]          # bf16 [Din_p, Dout_p], 2x scale folded in
            b = refs[2 + 2 * i][...]          # f32  [8,    Dout_p], 2x scale folded in
            # bf16 operands, f32 MXU accumulate.
            acc = jnp.dot(y.astype(jnp.bfloat16), w,
                          preferred_element_type=jnp.float32)
            bias = b if b.shape[0] == acc.shape[0] else b[:1]
            y = jnp.tanh(acc + bias)          # f32 VPU add + EUP tanh (v5e-safe)
        o_ref[...] = y.astype(o_ref.dtype)

    return kernel


def prepare_params(params, lane=_LANE, bias_rows=_SUBLANE):
    """One-time layout conversion of PyTorch-style params (w[out,in], b[out]) to
    pre-transposed, zero-padded, 2x-folded bf16 weights [in_pad, out_pad] and
    pre-broadcast f32 bias tiles [8, out_pad]."""
    prepared = []
    for w, b in params:
        dout, din = w.shape
        din_p, dout_p = _round_up(din, lane), _round_up(dout, lane)
        w_t = jnp.zeros((din_p, dout_p), jnp.float32).at[:din, :dout].set(2.0 * w.T)
        w_t = w_t.astype(jnp.bfloat16)        # padded lanes stay exactly 0.0 in bf16
        b_tile = (jnp.zeros((bias_rows, dout_p), jnp.float32)
                  .at[:, :dout].set(2.0 * b[None, :]))
        prepared.append((w_t, b_tile))
    return prepared


def fused_forward(x, prepared, out_features):
    """Single gridless pallas_call forward of the whole stack. x: [B, Din]."""
    B, din = x.shape
    din_p = prepared[0][0].shape[0]
    dout_p = prepared[-1][0].shape[1]

    # Pad the feature (lane) dim once in the wrapper; padded lanes hit zero weight rows.
    x_p = x if din == din_p else jnp.pad(x, ((0, 0), (0, din_p - din)))

    args = [x_p]
    for w_t, b_tile in prepared:
        args.extend((w_t, b_tile))

    out_p = pl.pallas_call(
        _make_fused_kernel(len(prepared)),
        out_shape=jax.ShapeDtypeStruct((B, dout_p), x.dtype),
        in_specs=[pl.BlockSpec(memory_space=pltpu.MemorySpace.VMEM) for _ in args],
        out_specs=pl.BlockSpec(memory_space=pltpu.MemorySpace.VMEM),
    )(*args)

    return out_p[:, :out_features]


def init_params(layers, key):
    """Deterministic init mimicking nn.Linear shapes: weight [out, in], bias [out]."""
    params = []
    for i in range(1, len(layers)):
        fan_in, fan_out = layers[i - 1], layers[i]
        key, kw, kb = jax.random.split(key, 3)
        bound = 1.0 / jnp.sqrt(fan_in)
        w = jax.random.uniform(kw, (fan_out, fan_in), jnp.float32, -bound, bound)
        b = jax.random.uniform(kb, (fan_out,), jnp.float32, -bound, bound)
        params.append((w, b))
    return params


if __name__ == "__main__":
    key = jax.random.PRNGKey(0)
    layers = [32, 64, 16]          # e.g. TwoLayerNet([32, 64, 16])
    batch = 8

    key, kx = jax.random.split(key)
    x = jax.random.normal(kx, (batch, layers[0]), jnp.float32)

    params = init_params(layers, key)          # PyTorch-convention params
    prepared = prepare_params(params)          # one-time transpose + pad + 2x fold + bf16

    fwd = jax.jit(functools.partial(fused_forward, out_features=layers[-1]))
    out = jax.block_until_ready(fwd(x, prepared))

    # Reference in plain f32 JAX against the original (unpadded, untransposed, unscaled)
    # params — tolerance is loose because the kernel's dot operands are bf16.
    ref = x
    for w, b in params:
        ref = jnp.tanh(2.0 * (ref @ w.T + b))
    assert out.shape == (batch, layers[-1])
    assert jnp.allclose(out, ref, atol=5e-2, rtol=0.0), float(jnp.max(jnp.abs(out - ref)))

    print("KERNEL_OK")
</pallas_src>

<mosaic_0001>
module attributes {stable_mosaic.version = 11 : i64} {
  func.func @kernel(%arg0: memref<8x128xf32, #tpu.memory_space<vmem>>, %arg1: memref<128x128xbf16, #tpu.memory_space<vmem>>, %arg2: memref<8x128xf32, #tpu.memory_space<vmem>>, %arg3: memref<128x128xbf16, #tpu.memory_space<vmem>>, %arg4: memref<8x128xf32, #tpu.memory_space<vmem>>, %arg5: memref<8x128xf32, #tpu.memory_space<vmem>>) attributes {dimension_semantics = [], scalar_prefetch = 0 : i64, scratch_operands = 0 : i64, tpu.core_type = #tpu.core_type<tc>} {
    %c0 = arith.constant 0 : index
    %c0_0 = arith.constant 0 : index
    %0 = vector.load %arg0[%c0, %c0_0] : memref<8x128xf32, #tpu.memory_space<vmem>>, vector<8x128xf32>
    %c0_1 = arith.constant 0 : index
    %c0_2 = arith.constant 0 : index
    %1 = vector.load %arg1[%c0_1, %c0_2] : memref<128x128xbf16, #tpu.memory_space<vmem>>, vector<128x128xbf16>
    %c0_3 = arith.constant 0 : index
    %c0_4 = arith.constant 0 : index
    %2 = vector.load %arg2[%c0_3, %c0_4] : memref<8x128xf32, #tpu.memory_space<vmem>>, vector<8x128xf32>
    %3 = arith.truncf %0 : vector<8x128xf32> to vector<8x128xbf16>
    %cst = arith.constant dense<0.000000e+00> : vector<8x128xf32>
    %4 = tpu.matmul %3, %1, %cst {dimension_numbers = #tpu.dot_dimension_numbers<[1], [0], [0], [1], [0, 0, 1, 1], [], []>} : vector<8x128xbf16>, vector<128x128xbf16>, vector<8x128xf32> -> vector<8x128xf32>
    %5 = arith.addf %4, %2 : vector<8x128xf32>
    %6 = math.tanh %5 : vector<8x128xf32>
    %c0_5 = arith.constant 0 : index
    %c0_6 = arith.constant 0 : index
    %7 = vector.load %arg3[%c0_5, %c0_6] : memref<128x128xbf16, #tpu.memory_space<vmem>>, vector<128x128xbf16>
    %c0_7 = arith.constant 0 : index
    %c0_8 = arith.constant 0 : index
    %8 = vector.load %arg4[%c0_7, %c0_8] : memref<8x128xf32, #tpu.memory_space<vmem>>, vector<8x128xf32>
    %9 = arith.truncf %6 : vector<8x128xf32> to vector<8x128xbf16>
    %cst_9 = arith.constant dense<0.000000e+00> : vector<8x128xf32>
    %10 = tpu.matmul %9, %7, %cst_9 {dimension_numbers = #tpu.dot_dimension_numbers<[1], [0], [0], [1], [0, 0, 1, 1], [], []>} : vector<8x128xbf16>, vector<128x128xbf16>, vector<8x128xf32> -> vector<8x128xf32>
    %11 = arith.addf %10, %8 : vector<8x128xf32>
    %12 = math.tanh %11 : vector<8x128xf32>
    %c0_10 = arith.constant 0 : index
    %c0_11 = arith.constant 0 : index
    %13 = vector.load %arg5[%c0_10, %c0_11] : memref<8x128xf32, #tpu.memory_space<vmem>>, vector<8x128xf32>
    tpu.vector_store %arg5[%c0_10, %c0_11], %12 {strides = array<i32>} : memref<8x128xf32, #tpu.memory_space<vmem>>, vector<8x128xf32>,
    return
  }
}

</mosaic_0001>

<bundles_post_ra>
// kernel: fused_forward.1
= control target key start
LH: loop header
LB: loop body
LE: loop exit
PB: predicated region body
PF: predicated region fallthrough
CT: control target
= control target key end

     0   :  { %10 = vsyncpa [#allocation3], 0  ;;  %s453_s0 = inlined_call_operand.vmem [shape: f32[8,128], index: 0, kind: input, shape index: {}]   ;;  %s454_s1 = inlined_call_operand.hbm [shape: bf16[128,128], index: 1, kind: input, shape index: {}]   ;;  %s455_s2 = inlined_call_operand.vmem [shape: f32[8,128], index: 2, kind: input, shape index: {}]   ;;  %s456_s3 = inlined_call_operand.hbm [shape: bf16[128,128], index: 3, kind: input, shape index: {}]   ;;  %s457_s4 = inlined_call_operand.vmem [shape: f32[8,128], index: 4, kind: input, shape index: {}]   ;;  %s458_s5 = inlined_call_operand.hbm [shape: f32[8,128], index: 5, kind: output, shape index: {}]  }
   0x1   :  { %11 = vsyncpa [#allocation6], 0 }
   0x2   :  { %12 = vsyncpa [#allocation4], 0  ;;  %s19_s20 = sshll.u32 %s454_s1, 4  ;;  %s400_s21 = smov [#allocation2]   ;;  %s20_s20 = int_to_ptr.hbm [resolvable:$true] %s19_s20 }
   0x3   :  { %s21_s22 = sshll.u32 %s400_s21, 4  ;;  %s34_s25 = sshll.u32 %s456_s3, 4  ;;  %s22_s22 = int_to_ptr.vmem [resolvable:$true] %s21_s22  ;;  %s35_s25 = int_to_ptr.hbm [resolvable:$true] %s34_s25 }
   0x4   :  { %s401_s26 = smov 64   ;;  %s402_s27 = smov 4  }
   0x5   :  { %27 = dma.hbm_to_vmem [thread:$0]  %s20_s20, 1024, %s22_s22, [#allocation3], %s401_s26, %s401_s26, %s402_s27  }
   0x6   :  { %s403_s28 = smov [#allocation5]  }
   0x7   :  { %s36_s29 = sshll.u32 %s403_s28, 4  ;;  %s37_s29 = int_to_ptr.vmem [resolvable:$true] %s36_s29 }
   0x8   :  { %42 = dma.hbm_to_vmem [thread:$0]  %s35_s25, 1024, %s37_s29, [#allocation6], %s401_s26, %s401_s26, %s402_s27  }
   0x9   :  { %394 = dma.done.wait [#allocation3], 1024  }
   0xa   :  { %395 = vsyncadd [#allocation3], 4294966272 }
   0xb   :  { %396 = dma.done.wait [#allocation6], 1024  }
   0xc   :  { %397 = vsyncadd [#allocation6], 4294966272  ;;  %v304_v0 = vld [vmem:[#allocation2 + $0x38] sm:$0xff]  ;;  %v303_v1 = vld [vmem:[#allocation2 + $0x30] sm:$0xff]  ;;  %s404_s8 = smov [#allocation7]  }
   0xd   :  { %120 = vmatpush.bf16.msra.mxu0 %v304_v0  ;;  %v312_v2 = vld [vmem:[#allocation5 + $0x38] sm:$0xff]  ;;  %v311_v3 = vld [vmem:[#allocation5 + $0x30] sm:$0xff]  ;;  %v302_v4 = vld [vmem:[#allocation2 + $0x28] sm:$0xff]  ;;  %s220_s9 = sshll.u32 %s404_s8, 4  ;;  %s221_s9 = int_to_ptr.vmem [resolvable:$true] %s220_s9 }
   0xe   :  { %200 = vmatpush.bf16.msra.mxu1 %v312_v2  ;;  %v310_v5 = vld [vmem:[#allocation5 + $0x28] sm:$0xff]  ;;  %v301_v6 = vld [vmem:[#allocation2 + $0x20] sm:$0xff]  ;;  %v300_v8 = vld [vmem:[#allocation2 + $0x18] sm:$0xff] }
   0xf   :  { %v309_v7 = vld [vmem:[#allocation5 + $0x20] sm:$0xff]  ;;  %v308_v9 = vld [vmem:[#allocation5 + $0x18] sm:$0xff]  ;;  %v299_v10 = vld [vmem:[#allocation2 + $0x10] sm:$0xff] }
  0x10   :  { %v298_v11 = vld [vmem:[#allocation2 + $0x8] sm:$0xff]  ;;  %v297_v12 = vld [vmem:[#allocation2] sm:$0xff]  ;;  %v307_v15 = vld [vmem:[#allocation5 + $0x10] sm:$0xff] }
  0x11   :  { %121 = vmatpush.bf16.msra.mxu0 %v303_v1  ;;  %v53_v13 = vld [vmem:[%s453_s0] sm:$0xff]  ;;  %v306_v16 = vld [vmem:[#allocation5 + $0x8] sm:$0xff] }
  0x12   :  { %201 = vmatpush.bf16.msra.mxu1 %v311_v3  ;;  %v71_v14 = vpack.c.bf16 %v53_v13, %v53_v13  ;;  %v305_v17 = vld [vmem:[#allocation5] sm:$0xff] }
  0x13   :  { %v70_v18 = vld [vmem:[%s455_s2] sm:$0xff]  ;;  %s222_s2 = sshll.u32 %s458_s5, 4  ;;  %s223_s2 = int_to_ptr.hbm [resolvable:$true] %s222_s2 }
  0x14   :  { %v150_v24 = vld [vmem:[%s457_s4] sm:$0xff] }
  0x15   :  { %122 = vmatpush.bf16.msra.mxu0 %v302_v4 }
  0x16   :  { %202 = vmatpush.bf16.msra.mxu1 %v310_v5 }
  0x19   :  { %123 = vmatpush.bf16.msra.mxu0 %v301_v6 }
  0x1a   :  { %203 = vmatpush.bf16.msra.mxu1 %v309_v7 }
  0x1d   :  { %124 = vmatpush.bf16.msra.mxu0 %v300_v8 }
  0x1e   :  { %204 = vmatpush.bf16.msra.mxu1 %v308_v9 }
  0x21   :  { %125 = vmatpush.bf16.msra.mxu0 %v299_v10 }
  0x22   :  { %205 = vmatpush.bf16.msra.mxu1 %v307_v15 }
  0x25   :  { %126 = vmatpush.bf16.msra.mxu0 %v298_v11 }
  0x26   :  { %206 = vmatpush.bf16.msra.mxu1 %v306_v16 }
  0x29   :  { %127 = vmatpush.bf16.msra.mxu0 %v297_v12 }
  0x2a   :  { %207 = vmatpush.bf16.msra.mxu1 %v305_v17 }
  0x2c   :  { %128 = vmatmul.bf16.vlgmr.msra.gmra.mxu0 %v71_v14 }
  0xa9   :  { %v129_v19 = vpop.f32.mrf.mxu0 }
  0xaa   :  { %v130_v20 = vadd.f32 %v129_v19, %v70_v18 }
  0xac   :  { %318 = vtanh.f32 %v130_v20 }
  0xb1   :  { %v131_v21 = vpop.f32.mrf.mxu0 }
  0xb2   :  { %v319_v22 = vpop.eup %318 }
  0xb3   :  { %v151_v23 = vpack.c.bf16 %v319_v22, %v319_v22 }
  0xb5   :  { %208 = vmatmul.bf16.vlgmr.msra.gmra.mxu1 %v151_v23 }
 0x132   :  { %v209_v25 = vpop.f32.mrf.mxu1 }
 0x133   :  { %v210_v26 = vadd.f32 %v209_v25, %v150_v24 }
 0x135   :  { %320 = vtanh.f32 %v210_v26 }
 0x13a   :  { %v211_v27 = vpop.f32.mrf.mxu1 }
 0x13b   :  { %v321_v28 = vpop.eup %320 }
 0x13c   :  { %214 = vst [vmem:[#allocation7] sm:$0xff] %v321_v28 }
 0x13d   :  { %225 = dma.vmem_to_hbm [thread:$0]  %s221_s9, 128, %s223_s2, [#allocation4]  }
 0x13e   :  { %398 = dma.done.wait [#allocation4], 128  }
 0x13f   :  { %399 = vsyncadd [#allocation4], 4294967168 }
 0x140   :  { %230 = vsyncpa [#allocation3], 1 }
 0x141   :  { %231 = vsyncpa [#allocation6], 1 }
 0x142   :  { %232 = vsyncpa [#allocation4], 1 }

</bundles_post_ra>
